<compile_context>
chip_gen: v5e
topology: v5e:2x2
jax: 0.10.0
libtpu: 0.0.40
codegen_flags: <defaults>
</compile_context>

<pallas_src>
import jax
import jax.numpy as jnp
from jax.experimental import pallas as pl
from jax.experimental.pallas import tpu as pltpu

LANES = 128
TARGET_BLOCK_BYTES = 4 << 20        # per input, per pipeline buffer
_PAD_POS = 30000.0                  # softplus(-(30000 - 0)) == 0.0 exactly in f32


def _cdiv(a, b):
    return (a + b - 1) // b


def _round_up(a, b):
    return _cdiv(a, b) * b


def _make_bpr_kernel(rows_valid, tiles_per_split, block_rows, needs_mask):
    def kernel(pos_ref, neg_ref, out_ref, acc_ref):
        i = pl.program_id(1)

        @pl.when(i == 0)
        def _init():
            acc_ref[...] = jnp.zeros_like(acc_ref)

        # Elementwise hot path (VPU + EUP only): stable softplus(neg - pos).
        pos = pos_ref[...].astype(jnp.float32)
        neg = neg_ref[...].astype(jnp.float32)
        d2 = neg - pos                                    # = -(pos - neg)
        loss = jnp.maximum(d2, 0.0) + jnp.log1p(jnp.exp(jnp.minimum(d2, -d2)))

        if needs_mask:
            # Ragged last block: rows >= rows_valid hold undefined (stale) data.
            row0 = (pl.program_id(0) * tiles_per_split + i) * block_rows
            row_idx = row0 + jax.lax.broadcasted_iota(
                jnp.int32, (block_rows, LANES), 0)
            loss = jnp.where(row_idx < rows_valid, loss, 0.0)

        # Per-step reduce into a single (8,128) vreg slab (pure VPU adds).
        acc_ref[...] += loss.reshape(-1, 8, LANES).sum(axis=0)

        @pl.when(i == pl.num_programs(1) - 1)
        def _finalize():
            out_ref[...] = acc_ref[...][None]

    return kernel


def bpr_loss(pos_preds: jax.Array, neg_preds: jax.Array,
             *, block_rows_override: int | None = None) -> jax.Array:
    """Pallas BPR loss.  pos_preds / neg_preds: 1-D float arrays, same shape.

    Returns a float32 scalar matching torch.sum(log(1 + exp(-(pos - neg)))).
    """
    assert pos_preds.shape == neg_preds.shape and pos_preds.ndim == 1
    n = pos_preds.shape[0]
    assert n >= 1

    # Promote to the wider common dtype (never silently downcast one input).
    dtype = jnp.promote_types(pos_preds.dtype, neg_preds.dtype)
    pos = pos_preds.astype(dtype)
    neg = neg_preds.astype(dtype)

    itemsize = jnp.dtype(dtype).itemsize
    pack = max(8, 32 // itemsize)        # sublane packing: 8 f32, 16 bf16, 32 i8

    # --- zero-copy 2D view; pad only the sub-128 ragged tail ----------------
    n_pad = (-n) % LANES
    if n_pad:
        # TODO(synk): unaligned n still costs one jnp.pad copy (<128 pad elems,
        # zero-contribution values); aligned n is fully zero-copy.
        pos = jnp.pad(pos, (0, n_pad), constant_values=_PAD_POS)
        neg = jnp.pad(neg, (0, n_pad), constant_values=0.0)
    rows = (n + n_pad) // LANES
    pos2d = pos.reshape(rows, LANES)
    neg2d = neg.reshape(rows, LANES)

    # --- tiling plan ---------------------------------------------------------
    if block_rows_override is not None:
        block_rows = _round_up(block_rows_override, pack)
    else:
        max_block_rows = TARGET_BLOCK_BYTES // (LANES * itemsize)
        block_rows = min(max_block_rows, _round_up(rows, pack))
        block_rows = _round_up(block_rows, pack)

    total_tiles = _cdiv(rows, block_rows)
    # 2-way outer split only when it adds zero padding (and is worth having).
    split = 2 if (total_tiles >= 4 and total_tiles % 2 == 0) else 1
    tiles_per_split = total_tiles // split
    needs_mask = total_tiles * block_rows > rows

    kernel = _make_bpr_kernel(rows, tiles_per_split, block_rows, needs_mask)
    in_map = lambda j, i: (j * tiles_per_split + i, 0)

    out = pl.pallas_call(
        kernel,
        out_shape=jax.ShapeDtypeStruct((split, 8, LANES), jnp.float32),
        grid_spec=pltpu.PrefetchScalarGridSpec(
            num_scalar_prefetch=0,
            grid=(split, tiles_per_split),
            in_specs=[
                pl.BlockSpec((block_rows, LANES), in_map),
                pl.BlockSpec((block_rows, LANES), in_map),
            ],
            out_specs=pl.BlockSpec((1, 8, LANES), lambda j, i: (j, 0, 0)),
            scratch_shapes=[pltpu.VMEM((8, LANES), jnp.float32)],
        ),
        compiler_params=pltpu.CompilerParams(
            dimension_semantics=("parallel", "arbitrary"),
            vmem_limit_bytes=40 << 20,
        ),
    )(pos2d, neg2d)

    # Tiny final reduce over at most (2, 8, 128) partials.
    return jnp.sum(out)


def bpr_loss_ref(pos_preds, neg_preds):
    d = pos_preds.astype(jnp.float32) - neg_preds.astype(jnp.float32)
    return jnp.sum(jax.nn.softplus(-d))


if __name__ == "__main__":
    key = jax.random.PRNGKey(0)
    k1, k2, k3, k4, k5, k6 = jax.random.split(key, 6)

    # Case 1: small aligned batch -> fully zero-copy path, single tile.
    b1 = 1024
    p1 = jax.random.normal(k1, (b1,), jnp.float32)
    n1 = jax.random.normal(k2, (b1,), jnp.float32)
    out1 = jax.block_until_ready(bpr_loss(p1, n1))
    ref1 = bpr_loss_ref(p1, n1)
    assert jnp.allclose(out1, ref1, rtol=1e-5, atol=1e-3), (out1, ref1)

    # Case 2: ragged batch, small forced blocks -> multi-tile grid, in-kernel
    # row mask for the partial last block, and the sub-128 tail pad path.
    b2 = 8192 + 37
    p2 = jax.random.normal(k3, (b2,), jnp.float32)
    n2 = jax.random.normal(k4, (b2,), jnp.float32)
    out2 = jax.block_until_ready(bpr_loss(p2, n2, block_rows_override=16))
    ref2 = bpr_loss_ref(p2, n2)
    assert jnp.allclose(out2, ref2, rtol=1e-5, atol=1e-2), (out2, ref2)

    # Case 3: bf16 inputs (16-sublane packing) + 2-way parallel outer split.
    b3 = 8192
    p3 = jax.random.normal(k5, (b3,), jnp.float32).astype(jnp.bfloat16)
    n3 = jax.random.normal(k6, (b3,), jnp.float32).astype(jnp.bfloat16)
    out3 = jax.block_until_ready(bpr_loss(p3, n3, block_rows_override=16))
    ref3 = bpr_loss_ref(p3, n3)
    assert jnp.allclose(out3, ref3, rtol=1e-4, atol=1e-1), (out3, ref3)

    print("KERNEL_OK")
</pallas_src>

<mosaic_0001>
module attributes {stable_mosaic.version = 11 : i64} {
  func.func @kernel(%arg0: i32, %arg1: i32, %arg2: memref<8x128xf32, #tpu.memory_space<vmem>>, %arg3: memref<8x128xf32, #tpu.memory_space<vmem>>, %arg4: memref<1x8x128xf32, #tpu.memory_space<vmem>>, %arg5: memref<8x128xf32, #tpu.memory_space<vmem>>) attributes {dimension_semantics = [#tpu.dimension_semantics<parallel>, #tpu.dimension_semantics<arbitrary>], iteration_bounds = array<i64: 1, 1>, scalar_prefetch = 0 : i64, scratch_operands = 1 : i64, tpu.core_type = #tpu.core_type<tc>, window_params = [{transform_indices = @transform_0, window_bounds = array<i64: 8, 128>}, {transform_indices = @transform_1, window_bounds = array<i64: 8, 128>}, {transform_indices = @transform_2, window_bounds = array<i64: 1, 8, 128>}]} {
    %c0_i32 = arith.constant 0 : i32
    %0 = arith.cmpi eq, %arg1, %c0_i32 : i32
    %1 = arith.extui %0 : i1 to i32
    %c0_i32_0 = arith.constant 0 : i32
    %2 = arith.cmpi ne, %1, %c0_i32_0 : i32
    scf.if %2 {
      %cst_12 = arith.constant 0.000000e+00 : f32
      %22 = vector.broadcast %cst_12 : f32 to vector<8x128xf32>
      %c0_13 = arith.constant 0 : index
      %c0_14 = arith.constant 0 : index
      %23 = vector.load %arg5[%c0_13, %c0_14] : memref<8x128xf32, #tpu.memory_space<vmem>>, vector<8x128xf32>
      tpu.vector_store %arg5[%c0_13, %c0_14], %22 {strides = array<i32>} : memref<8x128xf32, #tpu.memory_space<vmem>>, vector<8x128xf32>,
    } else {
    }
    %c0 = arith.constant 0 : index
    %c0_1 = arith.constant 0 : index
    %3 = vector.load %arg2[%c0, %c0_1] : memref<8x128xf32, #tpu.memory_space<vmem>>, vector<8x128xf32>
    %c0_2 = arith.constant 0 : index
    %c0_3 = arith.constant 0 : index
    %4 = vector.load %arg3[%c0_2, %c0_3] : memref<8x128xf32, #tpu.memory_space<vmem>>, vector<8x128xf32>
    %5 = arith.subf %4, %3 : vector<8x128xf32>
    %cst = arith.constant 0.000000e+00 : f32
    %6 = vector.broadcast %cst : f32 to vector<8x128xf32>
    %7 = arith.maximumf %5, %6 : vector<8x128xf32>
    %cst_4 = arith.constant 0.000000e+00 : f32
    %8 = vector.broadcast %cst_4 : f32 to vector<8x128xf32>
    %9 = arith.subf %8, %5 : vector<8x128xf32>
    %10 = arith.minimumf %5, %9 : vector<8x128xf32>
    %11 = math.exp %10 : vector<8x128xf32>
    %12 = math.log1p %11 : vector<8x128xf32>
    %13 = arith.addf %7, %12 : vector<8x128xf32>
    %c0_5 = arith.constant 0 : index
    %c0_6 = arith.constant 0 : index
    %14 = vector.load %arg5[%c0_5, %c0_6] : memref<8x128xf32, #tpu.memory_space<vmem>>, vector<8x128xf32>
    %15 = vector.shape_cast %13 : vector<8x128xf32> to vector<1x8x128xf32>
    %cst_7 = arith.constant dense<0.000000e+00> : vector<8x128xf32>
    %16 = vector.multi_reduction <add>, %15, %cst_7 [0] : vector<1x8x128xf32> to vector<8x128xf32>
    %17 = arith.addf %14, %16 : vector<8x128xf32>
    %c0_8 = arith.constant 0 : index
    %c0_9 = arith.constant 0 : index
    %18 = vector.load %arg5[%c0_8, %c0_9] : memref<8x128xf32, #tpu.memory_space<vmem>>, vector<8x128xf32>
    tpu.vector_store %arg5[%c0_8, %c0_9], %17 {strides = array<i32>} : memref<8x128xf32, #tpu.memory_space<vmem>>, vector<8x128xf32>,
    %c0_i32_10 = arith.constant 0 : i32
    %19 = arith.cmpi eq, %arg1, %c0_i32_10 : i32
    %20 = arith.extui %19 : i1 to i32
    %c0_i32_11 = arith.constant 0 : i32
    %21 = arith.cmpi ne, %20, %c0_i32_11 : i32
    scf.if %21 {
      %c0_12 = arith.constant 0 : index
      %c0_13 = arith.constant 0 : index
      %22 = vector.load %arg5[%c0_12, %c0_13] : memref<8x128xf32, #tpu.memory_space<vmem>>, vector<8x128xf32>
      %23 = vector.shape_cast %22 : vector<8x128xf32> to vector<1x8x128xf32>
      %c0_14 = arith.constant 0 : index
      %c0_15 = arith.constant 0 : index
      %c0_16 = arith.constant 0 : index
      %24 = vector.load %arg4[%c0_14, %c0_15, %c0_16] : memref<1x8x128xf32, #tpu.memory_space<vmem>>, vector<1x8x128xf32>
      tpu.vector_store %arg4[%c0_14, %c0_15, %c0_16], %23 {strides = array<i32>} : memref<1x8x128xf32, #tpu.memory_space<vmem>>, vector<1x8x128xf32>,
    } else {
    }
    return
  }
  func.func @transform_0(%arg0: i32, %arg1: i32) -> (i32, i32) {
    %c1_i32 = arith.constant 1 : i32
    %0 = arith.muli %arg0, %c1_i32 : i32
    %1 = arith.addi %0, %arg1 : i32
    %c0_i32 = arith.constant 0 : i32
    %c0_i32_0 = arith.constant 0 : i32
    return %1, %c0_i32 : i32, i32
  }
  func.func @transform_1(%arg0: i32, %arg1: i32) -> (i32, i32) {
    %c1_i32 = arith.constant 1 : i32
    %0 = arith.muli %arg0, %c1_i32 : i32
    %1 = arith.addi %0, %arg1 : i32
    %c0_i32 = arith.constant 0 : i32
    %c0_i32_0 = arith.constant 0 : i32
    return %1, %c0_i32 : i32, i32
  }
  func.func @transform_2(%arg0: i32, %arg1: i32) -> (i32, i32, i32) {
    %c0_i32 = arith.constant 0 : i32
    %c0_i32_0 = arith.constant 0 : i32
    %c0_i32_1 = arith.constant 0 : i32
    return %arg0, %c0_i32, %c0_i32_0 : i32, i32, i32
  }
}

</mosaic_0001>

<bundles_post_ra>
// kernel: tpu_custom_call.1
= control target key start
LH: loop header
LB: loop body
LE: loop exit
PB: predicated region body
PF: predicated region fallthrough
CT: control target
= control target key end

     0   :  { %7 = vsyncpa [#allocation4], 0  ;;  %s210_s0 = inlined_call_operand.hbm [shape: f32[8,128], index: 0, kind: input, shape index: {}]   ;;  %s211_s1 = inlined_call_operand.hbm [shape: f32[8,128], index: 1, kind: input, shape index: {}]   ;;  %s212_s2 = inlined_call_operand.hbm [shape: f32[1,8,128], index: 2, kind: output, shape index: {}]  }
   0x1   :  { %8 = vsyncpa [#allocation7], 0 }
   0x2   :  { %9 = vsyncpa [#allocation5], 0  ;;  %s18_s11 = sshll.u32 %s210_s0, 4  ;;  %s183_s12 = smov [#allocation3]   ;;  %s19_s11 = int_to_ptr.hbm [resolvable:$true] %s18_s11 }
   0x3   :  { %s20_s13 = sshll.u32 %s183_s12, 4  ;;  %s32_s16 = sshll.u32 %s211_s1, 4  ;;  %s21_s13 = int_to_ptr.vmem [resolvable:$true] %s20_s13  ;;  %s33_s16 = int_to_ptr.hbm [resolvable:$true] %s32_s16 }
   0x4   :  { %23 = dma.hbm_to_vmem [thread:$0]  %s19_s11, 128, %s21_s13, [#allocation4]  }
   0x5   :  { %s184_s17 = smov [#allocation6]  }
   0x6   :  { %s34_s18 = sshll.u32 %s184_s17, 4  ;;  %s35_s18 = int_to_ptr.vmem [resolvable:$true] %s34_s18 }
   0x7   :  { %37 = dma.hbm_to_vmem [thread:$0]  %s33_s16, 128, %s35_s18, [#allocation7]  }
   0x8   :  { %177 = dma.done.wait [#allocation4], 128  }
   0x9   :  { %178 = vsyncadd [#allocation4], 4294967168 }
   0xa   :  { %179 = dma.done.wait [#allocation7], 128  }
   0xb   :  { %180 = vsyncadd [#allocation7], 4294967168  ;;  %v53_v0 = vld [vmem:[#allocation3] sm:$0xff]  ;;  %v54_v1 = vld [vmem:[#allocation6] sm:$0xff]  ;;  %s185_s0 = smov [#allocation8]   ;;  %s87_s21 = sshll.u32 %s212_s2, 4  ;;  %s88_s21 = int_to_ptr.hbm [resolvable:$true] %s87_s21 }
   0xc   :  { %v55_v2 = vsub.f32 %v54_v1, %v53_v0  ;;  %s85_s1 = sshll.u32 %s185_s0, 4  ;;  %s86_s1 = int_to_ptr.vmem [resolvable:$true] %s85_s1 }
   0xe   :  { %v57_v3 = vsub.f32 0.0, %v55_v2  ;;  %v56_v13 = vmax.f32 %v55_v2, 0.0 }
  0x10   :  { %v58_v4 = vmin.f32 %v55_v2, %v57_v3 }
  0x12   :  { %v59_v5 = vmul.f32 1.442695, %v58_v4 }
  0x14   :  { %101 = vpow2.f32 %v59_v5 }
  0x1a   :  { %v102_v6 = vpop.eup %101 }
  0x1b   :  { %v61_v7 = vadd.f32 1.0, %v102_v6  ;;  %v64_v8 = vmul.f32 -0.5, %v102_v6  ;;  %v67_v10 = vand.u32 2147483647, %v102_v6 }
  0x1d   :  { %103 = vlog2.f32 %v61_v7  ;;  %v65_v9 = vadd.f32 1.0, %v64_v8  ;;  %vm68_vm0 = vcmp.lt.f32.partialorder %v67_v10, 0.0004427343 }
  0x1f   :  { %v66_v11 = vmul.f32 %v102_v6, %v65_v9 }
  0x23   :  { %v104_v12 = vpop.eup %103 }
  0x24   :  { %v63_v14 = vmul.f32 0.6931472, %v104_v12 }
  0x26   :  { %v69_v15 = vsel %vm68_vm0, %v66_v11, %v63_v14 }
  0x27   :  { %v70_v16 = vadd.f32 %v69_v15, %v56_v13 }
  0x29   :  { %79 = vst [vmem:[#allocation8] sm:$0xff] %v70_v16 }
  0x2a   :  { %90 = dma.vmem_to_hbm [thread:$0]  %s86_s1, 128, %s88_s21, [#allocation5]  }
  0x2b   :  { %181 = dma.done.wait [#allocation5], 128  }
  0x2c   :  { %182 = vsyncadd [#allocation5], 4294967168 }
  0x2d   :  { %95 = vsyncpa [#allocation4], 1 }
  0x2e   :  { %96 = vsyncpa [#allocation7], 1 }
  0x2f   :  { %97 = vsyncpa [#allocation5], 1 }

</bundles_post_ra>
